<compile_context>
chip_gen: v7x
topology: tpu7x:2x2x1
jax: 0.10.0
libtpu: 0.0.40
codegen_flags: <defaults>
</compile_context>

<pallas_src>
import jax
import jax.numpy as jnp
from jax.experimental import pallas as pl
from jax.experimental.pallas import tpu as pltpu


# ---------------------------------------------------------------------------
# Forward pass (the semantics of DummyModel.forward).
# ---------------------------------------------------------------------------
def dummy_model_forward(x):
    """DummyModel.forward: identity. No data movement at all."""
    return x


# ---------------------------------------------------------------------------
# Pallas kernel: direct HBM -> HBM memcpy (fresh output buffer).
# ---------------------------------------------------------------------------
# Only split into multiple concurrent DMAs when the array is genuinely large;
# a single descriptor already saturates the DMA engines for small/medium data.
_CHUNK_THRESHOLD_BYTES = 64 * 1024 * 1024
_MAX_CHUNKS = 4


def _make_hbm_memcpy_kernel(n_chunks, starts, sizes):
    """Kernel factory: issue `n_chunks` HBM->HBM DMAs, then wait on all.

    `starts`/`sizes` are static Python ints (chunk boundaries along the
    leading axis), baked into the kernel at trace time.
    """

    def kernel(x_hbm, o_hbm, sems):
        copies = []
        if n_chunks == 1:
            # Whole-array copy (also covers 0-d / non-sliceable inputs).
            cp = pltpu.make_async_copy(x_hbm, o_hbm, sems.at[0])
            cp.start()
            copies.append(cp)
        else:
            for c in range(n_chunks):
                s, sz = starts[c], sizes[c]
                cp = pltpu.make_async_copy(
                    x_hbm.at[pl.ds(s, sz)],
                    o_hbm.at[pl.ds(s, sz)],
                    sems.at[c],
                )
                cp.start()
                copies.append(cp)
        # Start all DMAs first (overlap), then wait on all of them.
        for cp in copies:
            cp.wait()

    return kernel


def dummy_model_forward_copy(x):
    """Identity materialized as a fresh buffer via a direct HBM->HBM DMA."""
    if x.size == 0:
        # Nothing to move; identity is exact.
        return x

    nbytes = x.size * jnp.dtype(x.dtype).itemsize
    leading = x.shape[0] if x.ndim > 0 else 1

    if nbytes > _CHUNK_THRESHOLD_BYTES and x.ndim > 0 and leading >= 2:
        n_chunks = min(_MAX_CHUNKS, leading)
    else:
        n_chunks = 1

    # Static chunk boundaries along the leading axis.
    base, rem = divmod(leading, n_chunks)
    starts, sizes, off = [], [], 0
    for c in range(n_chunks):
        sz = base + (1 if c < rem else 0)
        starts.append(off)
        sizes.append(sz)
        off += sz

    kernel = _make_hbm_memcpy_kernel(n_chunks, tuple(starts), tuple(sizes))

    # NOTE: if the caller can donate the input buffer, the fast path
    # (dummy_model_forward) already makes the copy unnecessary, so no
    # input_output_aliases is offered here (self-aliased DMA would be a no-op
    # anyway).
    return pl.pallas_call(
        kernel,
        out_shape=jax.ShapeDtypeStruct(x.shape, x.dtype),
        in_specs=[pl.BlockSpec(memory_space=pl.ANY)],
        out_specs=pl.BlockSpec(memory_space=pl.ANY),
        scratch_shapes=[pltpu.SemaphoreType.DMA((n_chunks,))],
    )(x)


if __name__ == "__main__":
    # Small deterministic input consistent with the module's conv
    # (3 input channels), though forward() is shape-agnostic identity.
    key = jax.random.PRNGKey(0)
    x = jax.random.normal(key, (2, 3, 16, 16), dtype=jnp.float32)

    # Optimal forward: pure identity, no kernel launch, no HBM traffic.
    y_fast = dummy_model_forward(x)

    # Pallas HBM->HBM memcpy path (fresh output buffer).
    y_copy = jax.block_until_ready(dummy_model_forward_copy(x))

    assert y_fast.shape == x.shape and y_fast.dtype == x.dtype
    assert y_copy.shape == x.shape and y_copy.dtype == x.dtype
    assert bool(jnp.all(y_fast == x))
    assert bool(jnp.all(y_copy == x))
    print("KERNEL_OK")
</pallas_src>

<mosaic_0001>
module attributes {stable_mosaic.version = 11 : i64} {
  func.func @kernel(%arg0: memref<2x3x16x16xf32, #tpu.memory_space<any>>, %arg1: memref<2x3x16x16xf32, #tpu.memory_space<any>>, %arg2: memref<1x!tpu.dma_semaphore, #tpu.memory_space<semaphore_mem>>) attributes {dimension_semantics = [], scalar_prefetch = 0 : i64, scratch_operands = 1 : i64, tpu.core_type = #tpu.core_type<tc>} {
    %c0_i32 = arith.constant 0 : i32
    %0 = tpu.memref_slice %arg2[%c0_i32] : memref<1x!tpu.dma_semaphore, #tpu.memory_space<semaphore_mem>> -> memref<1x!tpu.dma_semaphore, #tpu.memory_space<semaphore_mem>>
    %1 = tpu.memref_squeeze %0 : memref<1x!tpu.dma_semaphore, #tpu.memory_space<semaphore_mem>> -> memref<!tpu.dma_semaphore, #tpu.memory_space<semaphore_mem>>
    tpu.enqueue_dma source(%arg0 : memref<2x3x16x16xf32, #tpu.memory_space<any>>) target(%arg1 : memref<2x3x16x16xf32, #tpu.memory_space<any>>) target_semaphore(%1 : memref<!tpu.dma_semaphore, #tpu.memory_space<semaphore_mem>>)
    %c0_i32_0 = arith.constant 0 : i32
    %2 = tpu.memref_slice %arg2[%c0_i32_0] : memref<1x!tpu.dma_semaphore, #tpu.memory_space<semaphore_mem>> -> memref<1x!tpu.dma_semaphore, #tpu.memory_space<semaphore_mem>>
    %3 = tpu.memref_squeeze %2 : memref<1x!tpu.dma_semaphore, #tpu.memory_space<semaphore_mem>> -> memref<!tpu.dma_semaphore, #tpu.memory_space<semaphore_mem>>
    tpu.wait_dma2 semaphore(%3 : memref<!tpu.dma_semaphore, #tpu.memory_space<semaphore_mem>>) src(%arg0 : memref<2x3x16x16xf32, #tpu.memory_space<any>>) dst(%arg1 : memref<2x3x16x16xf32, #tpu.memory_space<any>>)
    return
  }
}

</mosaic_0001>

<bundles_post_ra>
// kernel: tpu_custom_call.1
= control target key start
LH: loop header
LB: loop body
LE: loop exit
PB: predicated region body
PF: predicated region fallthrough
CT: control target
= control target key end

     0   :  { %s36_s6 = smov [#allocation2]   ;;  %s37_s7 = smov [#allocation3]   ;;  %s55_s0 = inlined_call_operand.hbm [shape: f32[2,3,16,16], index: 0, kind: input, shape index: {}]   ;;  %s56_s1 = inlined_call_operand.hbm [shape: f32[2,3,16,16], index: 1, kind: output, shape index: {}]  }
   0x1   :  { %s38_s8 = smov 0  }
   0x2   :  { %18 = dma.general %s55_s0, 1536, %s56_s1, %s36_s6, %s37_s7, [#allocation4], %s38_s8, 0  }
   0x3   :  { %34 = dma.done.wait [#allocation2], 1536 }
   0x4   :  { %35 = vsyncadd [#allocation2], 4294965760 }
   0x5   :  { %24 = vsyncmov [#allocation2] }
   0x8   :  { %s25_s13 = vpop.sfrf %24 }
   0x9   :  { %p30_p0 = scmp.ne.s32.totalorder %s25_s13, 0 }
   0xb   :  { %29 = shalt.err (%p30_p0)  }

</bundles_post_ra>
